<compile_context>
chip_gen: v5e
topology: v5e:2x2
jax: 0.10.0
libtpu: 0.0.40
codegen_flags: <defaults>
</compile_context>

<pallas_src>
import jax
import jax.numpy as jnp
import numpy as np
from jax.experimental import pallas as pl
from jax.experimental.pallas import tpu as pltpu


# ---------------------------------------------------------------------------
# Kernel bodies
# ---------------------------------------------------------------------------

def _combine(x, num_actions, axis, out_dtype):
    """adv - mean(adv, axis) + value, dtype-aware (bf16 path keeps f32 reduce)."""
    if axis == 0:
        adv, value = x[:num_actions, :], x[num_actions:, :]
    else:
        adv, value = x[:, :num_actions], x[:, num_actions:]
    if x.dtype == jnp.bfloat16:
        # v6e/v7x have a bf16 VALU: combine in bf16, keep only the tiny A-way
        # sum in f32 for accuracy.
        mean_adv = (jnp.sum(adv.astype(jnp.float32), axis=axis, keepdims=True)
                    * (1.0 / num_actions)).astype(jnp.bfloat16)
        return (adv - mean_adv + value).astype(out_dtype)
    advf = adv.astype(jnp.float32)
    mean_adv = jnp.sum(advf, axis=axis, keepdims=True) * (1.0 / num_actions)
    return (advf - mean_adv + value.astype(jnp.float32)).astype(out_dtype)


def _dueling_kernel_rows(x_ref, y_ref):
    """Native PyTorch layout: x (TBR, A+1) batch-on-sublanes, y (TBR, A)."""
    num_actions = y_ref.shape[1]
    y_ref[...] = _combine(x_ref[...], num_actions, axis=1, out_dtype=y_ref.dtype)


def _dueling_kernel_t(xt_ref, yt_ref):
    """Lane-dense layout: x_t (A+1, TB) batch-on-lanes, y_t (A, TB)."""
    num_actions = yt_ref.shape[0]
    yt_ref[...] = _combine(xt_ref[...], num_actions, axis=0, out_dtype=yt_ref.dtype)


# ---------------------------------------------------------------------------
# Tile policies
# ---------------------------------------------------------------------------

def _pick_lane_tile(batch: int) -> int:
    """Lane tile (multiple of 128) for the (A+1, batch) layout.

    Capped (VMEM: ~1 MiB/block f32 even at the cap) and floored, and sized so
    large batches get >= ~8 grid steps (pipelining + dual-TC sharding on v7x).
    """
    MAX_TB, MIN_TB = 32768, 4096
    if batch <= MIN_TB:
        return batch                       # block == full dim is always legal
    tb = max(MIN_TB, min(MAX_TB, batch // 8))
    tb = 128 * (tb // 128)
    if batch % 128 == 0:
        # Prefer an exactly-dividing tile (all stores unmasked), but never drop
        # below MIN_TB to chase divisibility.
        t = tb
        while t >= MIN_TB and batch % t != 0:
            t -= 128
        if t >= MIN_TB:
            tb = t
    return max(tb, 128)


def _pick_row_tile(batch: int) -> int:
    """Sublane tile (multiple of 8) for the native (batch, A+1) layout.

    The 7/6-wide minor dim is lane-padded to 128 in VMEM, so the cap is tighter
    (2048 rows f32 -> ~1 MiB/block, ~4 MiB total with double buffering).
    """
    MAX_TBR, MIN_TBR = 2048, 256
    if batch <= MIN_TBR:
        return batch                       # block == full dim is always legal
    tbr = max(MIN_TBR, min(MAX_TBR, batch // 8))
    tbr = 8 * (tbr // 8)
    if batch % 8 == 0:
        t = tbr
        while t >= MIN_TBR and batch % t != 0:
            t -= 8
        if t >= MIN_TBR:
            tbr = t
    return max(tbr, 8)


def _cost_estimate(batch: int, num_actions: int, dtype) -> pl.CostEstimate:
    itemsize = jnp.dtype(dtype).itemsize
    return pl.CostEstimate(
        flops=3 * num_actions * batch,
        transcendentals=0,
        bytes_accessed=(2 * num_actions + 1) * batch * itemsize,
    )


# ---------------------------------------------------------------------------
# Wrappers
# ---------------------------------------------------------------------------

def dueling_output(x: jnp.ndarray) -> jnp.ndarray:
    """PyTorch layout, no relayout: x (batch, A+1) -> y (batch, A)."""
    assert x.ndim == 2
    batch, in_features = x.shape
    num_actions = in_features - 1
    tbr = _pick_row_tile(batch)

    return pl.pallas_call(
        _dueling_kernel_rows,
        out_shape=jax.ShapeDtypeStruct((batch, num_actions), x.dtype),
        grid_spec=pltpu.PrefetchScalarGridSpec(
            num_scalar_prefetch=0,
            grid=(pl.cdiv(batch, tbr),),
            # Minor dims (7 / 6) equal the full array dims -> legal blocks;
            # sublane dim is a multiple of 8 (or the full batch).
            in_specs=[pl.BlockSpec((tbr, in_features), lambda i: (i, 0))],
            out_specs=pl.BlockSpec((tbr, num_actions), lambda i: (i, 0)),
        ),
        compiler_params=pltpu.CompilerParams(
            dimension_semantics=("parallel",),   # shard batch tiles across TCs (v7x)
        ),
        cost_estimate=_cost_estimate(batch, num_actions, x.dtype),
    )(x)


def dueling_output_t(x_t: jnp.ndarray) -> jnp.ndarray:
    """Lane-dense layout: x_t (A+1, batch) -> y_t (A, batch).

    Preferred when the surrounding model keeps batch on the lane axis: every
    output store is a full unmasked vst.
    """
    assert x_t.ndim == 2
    in_features, batch = x_t.shape
    num_actions = in_features - 1
    tb = _pick_lane_tile(batch)

    return pl.pallas_call(
        _dueling_kernel_t,
        out_shape=jax.ShapeDtypeStruct((num_actions, batch), x_t.dtype),
        grid_spec=pltpu.PrefetchScalarGridSpec(
            num_scalar_prefetch=0,
            grid=(pl.cdiv(batch, tb),),
            # Sublane dims (7 / 6) equal the full array dims -> legal blocks;
            # lane dim is a multiple of 128 (or the full batch).
            in_specs=[pl.BlockSpec((in_features, tb), lambda i: (0, i))],
            out_specs=pl.BlockSpec((num_actions, tb), lambda i: (0, i)),
        ),
        compiler_params=pltpu.CompilerParams(
            dimension_semantics=("parallel",),
        ),
        cost_estimate=_cost_estimate(batch, num_actions, x_t.dtype),
    )(x_t)


def make_output_matrix(num_actions: int) -> np.ndarray:
    """The fixed buffer from the PyTorch module (reference check only)."""
    w = np.full((num_actions, num_actions + 1), -1.0 / num_actions, dtype=np.float32)
    w[:, -1] = 1.0
    for i in range(num_actions):
        w[i, i] = (num_actions - 1) / num_actions
    return w


if __name__ == "__main__":
    num_actions = 6
    batch = 8

    key = jax.random.PRNGKey(0)
    x = jax.random.normal(key, (batch, num_actions + 1), dtype=jnp.float32)

    w = make_output_matrix(num_actions)
    y_ref = np.asarray(x) @ w.T

    # Native PyTorch layout (no wrapper-side transposes any more).
    y = jax.block_until_ready(dueling_output(x))
    assert y.shape == (batch, num_actions)
    np.testing.assert_allclose(np.asarray(y), y_ref, rtol=1e-5, atol=1e-5)

    # Lane-dense layout for callers that keep batch on the lane axis.
    y_t = jax.block_until_ready(dueling_output_t(x.T))
    assert y_t.shape == (num_actions, batch)
    np.testing.assert_allclose(np.asarray(y_t).T, y_ref, rtol=1e-5, atol=1e-5)

    print("KERNEL_OK")
</pallas_src>

<mosaic_0001>
module attributes {stable_mosaic.version = 11 : i64} {
  func.func @_dueling_kernel_rows(%arg0: i32, %arg1: memref<8x7xf32, #tpu.memory_space<vmem>>, %arg2: memref<8x6xf32, #tpu.memory_space<vmem>>) attributes {dimension_semantics = [#tpu.dimension_semantics<parallel>], iteration_bounds = array<i64: 1>, scalar_prefetch = 0 : i64, scratch_operands = 0 : i64, tpu.core_type = #tpu.core_type<tc>, window_params = [{transform_indices = @transform_0, window_bounds = array<i64: 8, 7>}, {transform_indices = @transform_1, window_bounds = array<i64: 8, 6>}]} {
    %c0 = arith.constant 0 : index
    %c0_0 = arith.constant 0 : index
    %0 = vector.load %arg1[%c0, %c0_0] : memref<8x7xf32, #tpu.memory_space<vmem>>, vector<8x7xf32>
    %1 = vector.extract_strided_slice %0 {offsets = [0, 0], sizes = [8, 6], strides = [1, 1]} : vector<8x7xf32> to vector<8x6xf32>
    %2 = vector.extract_strided_slice %0 {offsets = [0, 6], sizes = [8, 1], strides = [1, 1]} : vector<8x7xf32> to vector<8x1xf32>
    %cst = arith.constant dense<0.000000e+00> : vector<8xf32>
    %3 = vector.multi_reduction <add>, %1, %cst [1] : vector<8x6xf32> to vector<8xf32>
    %4 = vector.shape_cast %3 : vector<8xf32> to vector<8x1xf32>
    %cst_1 = arith.constant 0.166666672 : f32
    %5 = vector.broadcast %cst_1 : f32 to vector<8x1xf32>
    %6 = arith.mulf %4, %5 : vector<8x1xf32>
    %7 = vector.broadcast %6 : vector<8x1xf32> to vector<8x6xf32>
    %8 = arith.subf %1, %7 : vector<8x6xf32>
    %9 = vector.broadcast %2 : vector<8x1xf32> to vector<8x6xf32>
    %10 = arith.addf %8, %9 : vector<8x6xf32>
    %c0_2 = arith.constant 0 : index
    %c0_3 = arith.constant 0 : index
    %11 = vector.load %arg2[%c0_2, %c0_3] : memref<8x6xf32, #tpu.memory_space<vmem>>, vector<8x6xf32>
    tpu.vector_store %arg2[%c0_2, %c0_3], %10 {strides = array<i32>} : memref<8x6xf32, #tpu.memory_space<vmem>>, vector<8x6xf32>,
    return
  }
  func.func @transform_0(%arg0: i32) -> (i32, i32) {
    %c0_i32 = arith.constant 0 : i32
    %c0_i32_0 = arith.constant 0 : i32
    return %arg0, %c0_i32 : i32, i32
  }
  func.func @transform_1(%arg0: i32) -> (i32, i32) {
    %c0_i32 = arith.constant 0 : i32
    %c0_i32_0 = arith.constant 0 : i32
    return %arg0, %c0_i32 : i32, i32
  }
}

</mosaic_0001>

<bundles_post_ra>
// kernel: tpu_custom_call.1
= control target key start
LH: loop header
LB: loop body
LE: loop exit
PB: predicated region body
PF: predicated region fallthrough
CT: control target
= control target key end

     0   :  { %6 = vsyncpa [#allocation3], 0  ;;  %s129_s0 = inlined_call_operand.hbm [shape: f32[8,7], index: 0, kind: input, shape index: {}]   ;;  %s130_s1 = inlined_call_operand.hbm [shape: f32[8,6], index: 1, kind: output, shape index: {}]  }
   0x1   :  { %7 = vsyncpa [#allocation4], 0  ;;  %s13_s8 = sshll.u32 %s129_s0, 4  ;;  %s110_s9 = smov [#allocation2]   ;;  %s14_s8 = int_to_ptr.hbm [resolvable:$true] %s13_s8 }
   0x2   :  { %s15_s10 = sshll.u32 %s110_s9, 4  ;;  %s16_s10 = int_to_ptr.vmem [resolvable:$true] %s15_s10 }
   0x3   :  { %18 = dma.hbm_to_vmem [thread:$0]  %s14_s8, 128, %s16_s10, [#allocation3]  }
   0x4   :  { %106 = dma.done.wait [#allocation3], 128  }
   0x5   :  { %107 = vsyncadd [#allocation3], 4294967168  ;;  %v111_v0 = vmov 6   ;;  %vm24_vm0 = vcmask 48128   ;;  %v23_v1 = vld [vmem:[#allocation2] sm:$0xff]  ;;  %s112_s11 = smov [#allocation5]  }
   0x6   :  { %57 = vset.pattern.permute.xlu0 %v111_v0  ;;  %v25_v2 = vsel %vm24_vm0, %v23_v1, 0.0  ;;  %s42_s12 = sshll.u32 %s112_s11, 4  ;;  %s44_s14 = sshll.u32 %s130_s1, 4  ;;  %s43_s12 = int_to_ptr.vmem [resolvable:$true] %s42_s12  ;;  %s45_s14 = int_to_ptr.hbm [resolvable:$true] %s44_s14 }
   0x7   :  { %26 = vadd.xlane.f32.xlu0 %v25_v2 }
  0x1b   :  { %32 = vperm.xlu0 %57, %v23_v1  }
  0x7a   :  { %v27_v3 = vpop.xlane.xlu0 %26 }
  0x7b   :  { %v28_v4 = vmul.f32 0.16666667, %v27_v3 }
  0x7d   :  { %v29_v5 = vsub.f32 %v23_v1, %v28_v4 }
  0x8d   :  { %v33_v6 = vpop.permute.xlu0 %32 }
  0x8e   :  { %v35_v7 = vadd.f32 %v33_v6, %v29_v5 }
  0x90   :  { %36 = vst.msk [vmem:[#allocation5] sm:$0xff] %vm24_vm0, %v35_v7 }
  0x91   :  { %47 = dma.vmem_to_hbm [thread:$0]  %s43_s12, 128, %s45_s14, [#allocation4]  }
  0x92   :  { %108 = dma.done.wait [#allocation4], 128  }
  0x93   :  { %109 = vsyncadd [#allocation4], 4294967168 }
  0x94   :  { %52 = vsyncpa [#allocation3], 1 }
  0x95   :  { %53 = vsyncpa [#allocation4], 1 }

</bundles_post_ra>
